<compile_context>
chip_gen: v7x
topology: tpu7x:2x2x1
jax: 0.10.0
libtpu: 0.0.40
codegen_flags: <defaults>
</compile_context>

<pallas_src>
import jax
import jax.numpy as jnp
from jax.experimental import pallas as pl
from jax.experimental.pallas import tpu as pltpu

ALPHA = 0.2  # LeakyReLU negative slope (only used by the reference path)


# --------------------------------------------------------------------------
# Kernel: one M-tile of the fused projection  out = h @ W_all
# --------------------------------------------------------------------------
def fused_gat_kernel(h_ref, w_ref, o_ref):
    # h_ref: (TILE_M, Fin) bf16   w_ref: (Fin, H*d) bf16 (resident across grid)
    # o_ref: (TILE_M, H*d) f32 -- final layout, no wrapper transpose needed.
    o_ref[...] = jnp.dot(
        h_ref[...], w_ref[...], preferred_element_type=jnp.float32
    ).astype(o_ref.dtype)


def _choose_tile_m(m):
    """Pick an M tile: MXU-shaped (256) when M is large, otherwise the largest
    sublane-aligned tile that still yields >= 2 grid steps (keeps both of
    v7x's TensorCores busy on the 'parallel' axis)."""
    for t in (256, 128, 64, 32, 16, 8):
        if m % t == 0 and m // t >= 2:
            return t
    return m  # tiny / unaligned M: single full-extent block


def fuse_head_weights(W_stacked):
    """(H, Fin, d) -> (Fin, H*d) so that h @ W_all == cat([h @ W_i], -1).
    Do this ONCE at parameter-load time, not per forward call."""
    H, Fin, d = W_stacked.shape
    return jnp.transpose(W_stacked, (1, 0, 2)).reshape(Fin, H * d)


# --------------------------------------------------------------------------
# Wrapper
# --------------------------------------------------------------------------
def multi_head_gat(h, adj, W_all):
    """h: (B, N, Fin), adj: (B, N, N) [unused by the module's forward],
    W_all: (Fin, H*d) head-fused weight.  Returns (B, N, H*d)."""
    del adj  # the PyTorch forward never uses adj
    B, N, Fin = h.shape
    HD = W_all.shape[1]
    out_dtype = h.dtype

    # Fold batch into the matmul M dimension.
    M = B * N
    h2 = h.reshape(M, Fin)

    # Sublane-align M (pad rows are zeros; sliced off after the call).
    M_pad = ((M + 7) // 8) * 8
    if M_pad != M:
        h2 = jnp.pad(h2, ((0, M_pad - M), (0, 0)))
    TILE_M = _choose_tile_m(M_pad)
    grid_m = M_pad // TILE_M

    # bf16 inputs (memory-bound kernel), f32 accumulate inside the kernel.
    h_bf = h2.astype(jnp.bfloat16)
    w_bf = W_all.astype(jnp.bfloat16)

    # VMEM budget: double-buffered activation/output tiles + resident weight.
    # Explicit limit keeps pipeline depth intact and stays inside v7x's 64 MiB.
    vmem_needed = (
        2 * TILE_M * Fin * 2                              # bf16 activation tiles
        + 2 * TILE_M * HD * jnp.dtype(out_dtype).itemsize # output tiles
        + 2 * Fin * HD * 2                                # weight buffers
    )
    vmem_limit = int(min(48 * 2**20, max(16 * 2**20, 4 * vmem_needed)))

    cost = pl.CostEstimate(
        flops=2 * M_pad * Fin * HD,
        transcendentals=0,
        bytes_accessed=(M_pad * Fin + Fin * HD) * 2
        + M_pad * HD * jnp.dtype(out_dtype).itemsize,
    )

    out2 = pl.pallas_call(
        fused_gat_kernel,
        out_shape=jax.ShapeDtypeStruct((M_pad, HD), out_dtype),
        grid_spec=pltpu.PrefetchScalarGridSpec(
            num_scalar_prefetch=0,
            grid=(grid_m,),  # M tiles; "parallel" -> shards across v7x's 2 TCs
            in_specs=[
                pl.BlockSpec((TILE_M, Fin), lambda i: (i, 0)),
                # Whole fused weight resident across the grid (constant block
                # index -> DMA'd once; no per-head re-DMA, no d=8 lane padding).
                pl.BlockSpec((Fin, HD), lambda i: (0, 0)),
            ],
            out_specs=pl.BlockSpec((TILE_M, HD), lambda i: (i, 0)),
        ),
        compiler_params=pltpu.CompilerParams(
            dimension_semantics=("parallel",),
            vmem_limit_bytes=vmem_limit,
        ),
        cost_estimate=cost,
    )(h_bf, w_bf)

    return out2[:M].reshape(B, N, HD)


# --------------------------------------------------------------------------
# Pure-JAX reference: the module's FULL forward (projection -> scores ->
# LeakyReLU -> softmax -> weighted sum -> concat), in f32.
# --------------------------------------------------------------------------
def reference_forward(h, W_stacked):
    outs = []
    for i in range(W_stacked.shape[0]):
        hp = h @ W_stacked[i]                              # (B, N, d)
        e = jnp.einsum("bnd,bmd->bnm", hp, hp)             # (B, N, N)
        e = jnp.where(e > 0, e, ALPHA * e)                 # LeakyReLU
        attn = jax.nn.softmax(e, axis=2)
        # h_prime.unsqueeze(2).repeat * attn.unsqueeze(-1), summed over dim 2
        outs.append(hp * jnp.sum(attn, axis=2, keepdims=True))
    return jnp.concatenate(outs, axis=-1)


if __name__ == "__main__":
    # Small shapes consistent with the module
    B, N, F_IN = 2, 8, 32
    OUT_FEATURES, NUM_HEADS = 32, 4
    D = OUT_FEATURES // NUM_HEADS

    key = jax.random.PRNGKey(0)
    k_h, k_w, k_adj = jax.random.split(key, 3)

    h = jax.random.normal(k_h, (B, N, F_IN), dtype=jnp.float32)
    adj = (jax.random.uniform(k_adj, (B, N, N)) > 0.5).astype(jnp.float32)  # unused in forward

    # Deterministic init mimicking nn.Linear: U(-1/sqrt(Fin), 1/sqrt(Fin)).
    # NOTE: self.a parameters and dropout exist in __init__ but are never used
    # by the module's forward, so they are not materialized here.
    bound = 1.0 / (F_IN ** 0.5)
    W_stacked = jax.random.uniform(
        k_w, (NUM_HEADS, F_IN, D), minval=-bound, maxval=bound, dtype=jnp.float32)

    # Head fusion hoisted out of the forward path (parameter-load time).
    W_all = fuse_head_weights(W_stacked)

    out = multi_head_gat(h, adj, W_all)
    out = jax.block_until_ready(out)
    assert out.shape == (B, N, OUT_FEATURES), out.shape

    # 1) Exactness vs. the same bf16-input / f32-accumulate math done by XLA.
    ref_bf16 = jnp.dot(
        h.reshape(B * N, F_IN).astype(jnp.bfloat16),
        W_all.astype(jnp.bfloat16),
        preferred_element_type=jnp.float32,
    ).reshape(B, N, OUT_FEATURES)
    assert jnp.allclose(out, ref_bf16, rtol=1e-4, atol=1e-4), "mismatch vs bf16 matmul"

    # 2) Semantics vs. the full f32 attention forward (tolerance reflects the
    #    bf16 input cast; the attention block itself is an exact identity).
    ref = reference_forward(h, W_stacked)
    assert jnp.allclose(out, ref, rtol=5e-2, atol=5e-2), "mismatch vs full reference"

    print("KERNEL_OK")
</pallas_src>

<mosaic_0001>
module attributes {stable_mosaic.version = 11 : i64} {
  func.func @fused_gat_kernel(%arg0: i32, %arg1: memref<8x32xbf16, #tpu.memory_space<vmem>>, %arg2: memref<32x32xbf16, #tpu.memory_space<vmem>>, %arg3: memref<8x32xf32, #tpu.memory_space<vmem>>) attributes {dimension_semantics = [#tpu.dimension_semantics<parallel>], iteration_bounds = array<i64: 2>, scalar_prefetch = 0 : i64, scratch_operands = 0 : i64, tpu.core_type = #tpu.core_type<tc>, window_params = [{transform_indices = @transform_0, window_bounds = array<i64: 8, 32>}, {pipeline_mode = #tpu.pipeline_mode<synchronous>, transform_indices = @transform_1, window_bounds = array<i64: 32, 32>}, {transform_indices = @transform_2, window_bounds = array<i64: 8, 32>}]} {
    %c0 = arith.constant 0 : index
    %c0_0 = arith.constant 0 : index
    %0 = vector.load %arg1[%c0, %c0_0] : memref<8x32xbf16, #tpu.memory_space<vmem>>, vector<8x32xbf16>
    %c0_1 = arith.constant 0 : index
    %c0_2 = arith.constant 0 : index
    %1 = vector.load %arg2[%c0_1, %c0_2] : memref<32x32xbf16, #tpu.memory_space<vmem>>, vector<32x32xbf16>
    %cst = arith.constant dense<0.000000e+00> : vector<8x32xf32>
    %2 = tpu.matmul %0, %1, %cst {dimension_numbers = #tpu.dot_dimension_numbers<[1], [0], [0], [1], [0, 0, 1, 1], [], []>} : vector<8x32xbf16>, vector<32x32xbf16>, vector<8x32xf32> -> vector<8x32xf32>
    %c0_3 = arith.constant 0 : index
    %c0_4 = arith.constant 0 : index
    %3 = vector.load %arg3[%c0_3, %c0_4] : memref<8x32xf32, #tpu.memory_space<vmem>>, vector<8x32xf32>
    tpu.vector_store %arg3[%c0_3, %c0_4], %2 {strides = array<i32>} : memref<8x32xf32, #tpu.memory_space<vmem>>, vector<8x32xf32>,
    return
  }
  func.func @transform_0(%arg0: i32) -> (i32, i32) {
    %c0_i32 = arith.constant 0 : i32
    %c0_i32_0 = arith.constant 0 : i32
    return %arg0, %c0_i32 : i32, i32
  }
  func.func @transform_1(%arg0: i32) -> (i32, i32) {
    %c0_i32 = arith.constant 0 : i32
    %c0_i32_0 = arith.constant 0 : i32
    %c0_i32_1 = arith.constant 0 : i32
    return %c0_i32, %c0_i32_0 : i32, i32
  }
  func.func @transform_2(%arg0: i32) -> (i32, i32) {
    %c0_i32 = arith.constant 0 : i32
    %c0_i32_0 = arith.constant 0 : i32
    return %arg0, %c0_i32 : i32, i32
  }
}

</mosaic_0001>

<bundles_post_ra>
// kernel: tpu_custom_call.1
= control target key start
LH: loop header
LB: loop body
LE: loop exit
PB: predicated region body
PF: predicated region fallthrough
CT: control target
= control target key end

     0   :  { %7 = vsyncpa [#allocation3], 0  ;;  %s771_s0 = inlined_call_operand.hbm [shape: bf16[16,32], index: 0, kind: input, shape index: {}]   ;;  %s772_s1 = inlined_call_operand.hbm [shape: bf16[32,32], index: 1, kind: input, shape index: {}]   ;;  %s773_s2 = inlined_call_operand.hbm [shape: f32[16,32], index: 2, kind: output, shape index: {}]  }
   0x1   :  { %9 = vsyncpa [#allocation3 + $0x1], 0 }
   0x2   :  { %10 = vsyncpa [#allocation6], 0 }
   0x3   :  { %11 = vsyncpa [#allocation4], 0 }
   0x4   :  { %13 = vsyncpa [#allocation4 + $0x1], 0  ;;  %s574_s9 = smov 0   ;;  %s576_s10 = smov 0  }
   0x5   :  { %s578_s11 = smov 0   ;;  %s580_s12 = smov 0  }
   0x6 LB: > { %s595_s13 = sadd.s32 4294967295, %s550_s12   ;;  %s331_s14 = sadd.s32 4294967294, %s550_s12   ;;  %s550_s12 = sphi %s580_s12, %s793_s12   ;;  %s546_s11 = sphi %s578_s11, %s792_s11   ;;  %s542_s10 = sphi %s576_s10, %s791_s10   ;;  %s538_s9 = sphi %s574_s9, %s790_s9  }
   0x7   : > { %p39_p0 = scmp.ne.s32.totalorder %s542_s10, %s538_s9  ;;  %p774_p1 = scmp.eq.s32.totalorder %s595_s13, 0 }
   0x8   : > { %p90_p3 = scmp.eq.s32.totalorder %s331_s14, 1  ;;  %p332_p5 = scmp.ge.s32.totalorder %s550_s12, 1 }
   0x9   : > { %p604_p4 = por %p774_p1, %p39_p0  ;;  %p97_p7 = scmp.lt.s32.totalorder %s550_s12, 3 }
   0xa   : > { %p609_p6 = por %p90_p3, %p39_p0  ;;  %s552_s18 = smov [#allocation5]  }
   0xb   : > { %s777_s15 = scalar_select %p604_p4, 1, 0 }
   0xc   : > { %s778_s16 = scalar_select %p609_p6, 1, 0 }
   0xd   : > { %p614_p8 = pnand %p332_p5, %p97_p7  ;;  %s109_s19 = sshll.u32 %s552_s18, 4  ;;  %s618_s19 = int_to_ptr.vmem [resolvable:$true] %s109_s19 }
   0xe   : > { %s630_s21 = sadd.s32 1, %s550_s12   ;;  %s26_s22 = sadd.s32 1, %s546_s11 }
   0xf   : > { %s779_s17 = scalar_select %p614_p8, 1, 0 }
  0x10   : > { %p367_p9 = pneg %p614_p8  ;;  %s23_s23 = ssub.s32 %s550_s12, %s630_s21 }
  0x11   : > { %s422_s26 = scalar_lea.hbm %s772_s1, 256 }
  0x12   : > { %p625_p11 = pnand %p367_p9, %p774_p1  ;;  %p423_p12 = scmp.ne.s32.totalorder %s772_s1, %s422_s26 }
  0x13   : > { %p429_p5 = scmp.lt.u32.totalorder %s422_s26, %s772_s1 }
  0x14   : > { %p424_p13 = pneg %p625_p11 }
  0x16   : > { %p425_p0 = pnand %p424_p13, %p423_p12 }
  0x18   : > { %p426_p3 = pneg %p425_p0 }
  0x1a   : > { %p431_p7 = pnand %p429_p5, %p426_p3 }
  0x1c   : > { %434 = shalt.err (!%p431_p7)
}
  0x1d   : > { %s435_s3 = scalar_lea.vmem %s618_s19, 256  ;;  %p443_p2 = scmp.lt.s32.totalorder %s618_s19, %s618_s19 }
  0x1e   : > { %p436_p9 = scmp.ne.s32.totalorder %s618_s19, %s435_s3  ;;  %p444_p6 = scmp.lt.s32.totalorder %s435_s3, %s435_s3 }
  0x20   : > { %p438_p10 = pnand %p436_p9, %p424_p13  ;;  %p445_p4 = por %p444_p6, %p443_p2 }
  0x22   : > { %p439_p1 = pneg %p438_p10 }
  0x24   : > { %p446_p8 = pnand %p445_p4, %p439_p1 }
  0x26   : > { %449 = shalt.err (!%p446_p8)
}
  0x27   : > { %s553_s4 = smov 64   ;;  %s554_s5 = smov 4  }
  0x28   : > { %370 = dma.hbm_to_vmem [thread:$0]  (!%p625_p11), %s772_s1, 256, %s618_s19, [#allocation6], %s553_s4, %s553_s4, %s554_s5  }
  0x29   : > { %p24_p2 = scmp.eq.s32.totalorder %s23_s23, 0  ;;  %p33_p1 = scmp.ne.s32.totalorder %s546_s11, %s542_s10 }
  0x2a   : > { %p34_p4 = scmp.eq.s32.totalorder %s550_s12, 0  ;;  %p380_p6 = scmp.lt.s32.totalorder %s550_s12, 2 }
  0x2b   : > { %s661_s8 = scalar_select %p24_p2, %s546_s11, %s26_s22  }
  0x2c   : > { %p35_p8 = por %p34_p4, %p33_p1  ;;  %p781_p10 = scmp.eq.s32.totalorder %s595_s13, 1 }
  0x2d   : > { %s123_s18 = sand.u32 1, %s546_s11   ;;  %s336_s24 = sshll.u32 %s550_s12, 6 }
  0x2e   : > { %p665_p12 = por %p781_p10, %p33_p1  ;;  %s335_s25 = sshll.u32 %s123_s18, 2 }
  0x2f   : > { %s674_s27 = scalar_lea.hbm %s771_s0, %s336_s24  ;;  %s127_s19 = scalar_lea.vmem [#allocation2], %s335_s25 }
  0x30   : > { %s134_s22 = sshll.u32 %s127_s19, 4  ;;  %p676_p11 = pnand %p380_p6, %p35_p8  ;;  %s680_s22 = int_to_ptr.vmem [resolvable:$true] %s134_s22 }
  0x31   : > { %s124_s28 = scalar_lea.sflag [#allocation3], %s123_s18  ;;  %s450_s29 = scalar_lea.hbm %s674_s27, 64 }
  0x32   : > { %p451_p13 = scmp.ne.s32.totalorder %s674_s27, %s450_s29  ;;  %p452_p0 = pneg %p676_p11 }
  0x33   : > { %s455_s4 = scalar_lea.hbm %s771_s0, 128  ;;  %p456_p7 = scmp.lt.u32.totalorder %s674_s27, %s771_s0 }
  0x34   : > { %p453_p3 = pnand %p452_p0, %p451_p13  ;;  %p457_p9 = scmp.lt.u32.totalorder %s455_s4, %s450_s29 }
  0x35   : > { %p459_p1 = scmp.lt.u32.totalorder %s450_s29, %s674_s27 }
  0x36   : > { %p454_p5 = pneg %p453_p3  ;;  %p458_p2 = por %p457_p9, %p456_p7 }
  0x38   : > { %p460_p4 = por %p459_p1, %p458_p2 }
  0x3a   : > { %p461_p6 = pnand %p460_p4, %p454_p5 }
  0x3c   : > { %464 = shalt.err (!%p461_p6)
}
  0x3d   : > { %s465_s7 = scalar_lea.vmem %s680_s22, 64  ;;  %s555_s18 = smov [#allocation2]  }
  0x3e   : > { %p466_p8 = scmp.ne.s32.totalorder %s680_s22, %s465_s7  ;;  %s470_s24 = sshll.u32 %s555_s18, 4  ;;  %s471_s24 = int_to_ptr.vmem [resolvable:$false] %s470_s24 }
  0x3f   : > { %s472_s25 = scalar_lea.vmem %s471_s24, 128  ;;  %p473_p3 = scmp.lt.s32.totalorder %s680_s22, %s471_s24 }
  0x40   : > { %p468_p10 = pnand %p466_p8, %p452_p0  ;;  %p474_p7 = scmp.lt.s32.totalorder %s472_s25, %s465_s7 }
  0x42   : > { %p469_p13 = pneg %p468_p10  ;;  %p475_p9 = por %p474_p7, %p473_p3 }
  0x44   : > { %p476_p2 = pnand %p475_p9, %p469_p13 }
  0x46   : > { %479 = shalt.err (!%p476_p2)
}
  0x47   : > { %374 = dma.hbm_to_vmem [thread:$0]  (!%p676_p11), %s674_s27, 64, %s680_s22, %s124_s28  }
  0x48   : > { %p784_p5 = scmp.ne.s32.totalorder %s779_s17, 0 }
  0x49   : > { %s710_s20 = sand.u32 (!%p784_p5), 1, %s542_s10   ;;  %p785_p0 = scmp.ne.s32.totalorder (!%p784_p5), %s777_s15, 0 }
  0x4a   : > { %143 = sbr.rel (%p784_p5) target bundleno = 321 (0x141), region = 28  ;;  %s338_s26 = sshll.u32 (!%p784_p5), %s710_s20, 2 }
  0x4b   : > { %s146_s19 = scalar_lea.sflag (!%p784_p5), [#allocation3], %s710_s20  ;;  %s149_s29 = scalar_lea.vmem (!%p784_p5), [#allocation2], %s338_s26 }
  0x51   : > { %525 = dma.done.wait (%p785_p0), %s146_s19, 64  }
  0x52   : > { %527 = vsyncadd (%p785_p0), %s146_s19, 4294967232  ;;  %p786_p1 = scmp.eq.s32.totalorder %s595_s13, 0 }
  0x54   : > { %529 = dma.done.wait (%p786_p1), [#allocation6], 256   ;;  %p787_p11 = pmov %p786_p1 }
  0x55   : > { %v556_v0 = vmov 0.0   ;;  %vm557_vm0 = vmmov 0   ;;  %v420_v1 = vld [vmem:[#allocation5] sm:$0xff]   ;;  %v421_v2 = vld [vmem:[#allocation5 + $0x8] sm:$0xff]   ;;  %v175_v3 = vld [vmem:[%s149_s29] sm:$0xf] }
  0x56   : > { %531 = vsyncadd (%p787_p11), [#allocation6], 4294967040  ;;  %351 = vmatprep.subr.bf16.mxu0 %v556_v0  ;;  %355 = vmatprep.mubr.msk.bf16.mxu0 %vm557_vm0, %v556_v0  ;;  %vm192_vm1 = vcmask 261120   ;;  %s340_s15 = sshll.u32 %s710_s20, 3  ;;  %s345_s17 = sshll.u32 %s595_s13, 7 }
  0x57   : > { %352 = vmatpush3.bf16.msra.mxu0 %v420_v1  ;;  %s173_s27 = scalar_lea.vmem [#allocation7], %s340_s15  ;;  %s727_s30 = scalar_lea.hbm %s773_s2, %s345_s17 }
  0x58   : > { %353 = vmatprep.subr.bf16.mxu0 %v556_v0  ;;  %s251_s22 = sshll.u32 %s173_s27, 4  ;;  %s238_s3 = scalar_lea.sflag [#allocation4], %s710_s20  ;;  %s729_s22 = int_to_ptr.vmem [resolvable:$true] %s251_s22 }
  0x59   : > { %s480_s4 = scalar_lea.vmem %s729_s22, 128  ;;  %s558_s13 = smov [#allocation7]  }
  0x5a   : > { %p481_p4 = scmp.ne.s32.totalorder %s729_s22, %s480_s4  ;;  %s484_s5 = sshll.u32 %s558_s13, 4  ;;  %s485_s5 = int_to_ptr.vmem [resolvable:$false] %s484_s5 }
  0x5b   : > { %354 = vmatpush3.bf16.msra.mxu0 %v421_v2  ;;  %s486_s6 = scalar_lea.vmem %s485_s5, 256  ;;  %p487_p10 = scmp.lt.s32.totalorder %s729_s22, %s485_s5 }
  0x5c   : > { %p482_p6 = pnand %p481_p4, %p665_p12  ;;  %p488_p13 = scmp.lt.s32.totalorder %s486_s6, %s480_s4 }
  0x5e   : > { %356 = vmatmul.mubr.msk.bf16.vlgmr.msra.gmra.mrb[0].mxu0 %vm192_vm1, %v175_v3  ;;  %p483_p8 = pneg %p482_p6  ;;  %p489_p3 = por %p488_p13, %p487_p10 }
  0x60   : > { %p490_p7 = pnand %p489_p3, %p483_p8 }
 0x131   : > { %v230_v4 = vpop.f32.mrb[0].mxu0 }
 0x132   : > { %236 = vst.msk [vmem:[%s173_s27] sm:$0xff] %vm192_vm1, %v230_v4  ;;  %v357_v5 = vpop.f32.mrb[1].mxu0 }
 0x133   : > { %v233_v6 = vpop.f32.mrb[2].mxu0 }
 0x134   : > { %493 = shalt.err (!%p490_p7)
}
 0x135   : > { %s494_s7 = scalar_lea.hbm %s727_s30, 128  ;;  %s498_s25 = scalar_lea.hbm %s773_s2, 256 }
 0x136   : > { %p495_p9 = scmp.ne.s32.totalorder %s727_s30, %s494_s7  ;;  %p499_p0 = scmp.lt.u32.totalorder %s727_s30, %s773_s2 }
 0x137   : > { %p500_p1 = scmp.lt.u32.totalorder %s498_s25, %s494_s7  ;;  %p502_p4 = scmp.lt.u32.totalorder %s494_s7, %s727_s30 }
 0x138   : > { %p496_p2 = pnand %p495_p9, %p665_p12 }
 0x139   : > { %p501_p11 = por %p500_p1, %p499_p0 }
 0x13a   : > { %p497_p5 = pneg %p496_p2 }
 0x13b   : > { %p503_p6 = por %p502_p4, %p501_p11 }
 0x13d   : > { %p504_p8 = pnand %p503_p6, %p497_p5 }
 0x13f   : > { %507 = shalt.err (!%p504_p8)
}
 0x140   : > { %365 = dma.vmem_to_hbm [thread:$0]  (%p665_p12), %s729_s22, 128, %s727_s30, %s238_s3   ;;  %v358_v7 = vpop.f32.mrb[3].mxu0 }
 0x141 PF: > { %s263_s19 = sand.u32 1, %s538_s9   ;;  %p788_p10 = scmp.ne.s32.totalorder %s778_s16, 0 }
 0x142   : > { %p789_p13 = scmp.ge.s32.totalorder %s550_s12, 2  ;;  %s264_s29 = scalar_lea.sflag [#allocation4], %s263_s19 }
 0x144   : > { %p376_p3 = pnand %p789_p13, %p788_p10 }
 0x146   : > { %533 = dma.done.wait (!%p376_p3), %s264_s29, 128  }
 0x147   : > { %535 = vsyncadd (!%p376_p3), %s264_s29, 4294967168  ;;  %p16_p7 = scmp.ge.s32.totalorder %s630_s21, 4   ;;  %s790_s9 = smov %s542_s10 }
 0x148   : > { %s791_s10 = smov %s546_s11  ;;  %s792_s11 = smov %s661_s8 }
 0x149   : > { %s793_s12 = smov %s630_s21  ;;  %18 = sbr.rel (!%p16_p7) target bundleno = 6 (0x6), region = 77 }
 0x150   :  { %269 = vsyncpa [#allocation3], 1 }
 0x151   :  { %271 = vsyncpa [#allocation3 + $0x1], 1 }
 0x152   :  { %272 = vsyncpa [#allocation6], 1 }
 0x153   :  { %273 = vsyncpa [#allocation4], 1 }
 0x154   :  { %275 = vsyncpa [#allocation4 + $0x1], 1 }

</bundles_post_ra>
